<compile_context>
chip_gen: v5e
topology: v5e:2x2
jax: 0.10.0
libtpu: 0.0.40
codegen_flags: <defaults>
</compile_context>

<pallas_src>
import jax
import jax.numpy as jnp
import numpy as np
from jax.experimental import pallas as pl
from jax.experimental.pallas import tpu as pltpu


def _scatter_kernel(sb_ref, nblk_ref, idx_ref, feat_t_ref, out_ref):
    # sb_ref:     [B*num_tiles] int32 SMEM  first voxel-block of each (b, tile)
    # nblk_ref:   [B*num_tiles] int32 SMEM  voxel-block count of each (b, tile)
    # idx_ref:    [pk, 1]  int32            folded global indices of one P-block
    # feat_t_ref: [C, pk]                   pre-transposed features of that block
    # out_ref:    [C, tile_n] float32       lane-dense canvas tile (accumulator)
    del sb_ref  # only consumed by the BlockSpec index_maps
    b = pl.program_id(0)
    t = pl.program_id(1)
    k = pl.program_id(2)
    num_tiles = pl.num_programs(1)

    pk = idx_ref.shape[0]
    tn = out_ref.shape[-1]

    # Output block index ignores k -> out_ref stays resident across the k axis:
    # zero once, accumulate straight into it (no separate acc scratch).
    @pl.when(k == 0)
    def _():
        out_ref[...] = jnp.zeros_like(out_ref)

    # Skip k-steps past this tile's real block count.  Empty / low-density
    # tiles only pay for the zero-init above; the clamped input index_maps
    # repeat the previous block index, so their DMA is skipped too.
    @pl.when(k < nblk_ref[b * num_tiles + t])
    def _():
        base = (b * num_tiles + t) * tn
        local = idx_ref[...] - base                               # [pk, 1]
        col = jax.lax.broadcasted_iota(jnp.int32, (pk, tn), 1)    # [pk, tn]
        onehot = (col == local).astype(feat_t_ref.dtype)          # 0/1 exact
        out_ref[...] += jnp.dot(
            feat_t_ref[...], onehot,
            preferred_element_type=jnp.float32).astype(out_ref.dtype)


def point_pillars_scatter(voxel_features, coords, batch_size, ny, nx,
                          *, tile_n=512, pk=128, matmul_dtype=None):
    """Scatter pillar features to a dense pseudo-image.

    voxel_features: [P, C] float32
    coords:         [P, 4] int32  (batch, z, y, x)
    returns:        [B, C, ny, nx] float32 (NCHW, like the PyTorch module)

    tile_n:       spatial tile (output lanes); 512 is a good default on
                  v5e/v6e/v7x.  ny*nx is padded up to a multiple of tile_n.
    pk:           voxel-block (contraction) tile, multiple of 128.
    matmul_dtype: optional (e.g. jnp.bfloat16) MXU operand dtype on v6e/v7x;
                  None keeps float32 for bit-parity with the torch reference.
    """
    P, C = voxel_features.shape
    assert tile_n % 128 == 0 and pk % 128 == 0 and C % 8 == 0
    nynx = ny * nx
    num_tiles = -(-nynx // tile_n)
    nynx_pad = num_tiles * tile_n          # padded canvas width per batch
    sentinel = batch_size * nynx_pad       # never matches any tile column

    # ---- host-side preprocessing (coords are concrete here) ----------------
    coords_np = np.asarray(jax.device_get(coords)).astype(np.int64)
    bid, yy, xx = coords_np[:, 0], coords_np[:, 2], coords_np[:, 3]
    valid = ((bid >= 0) & (bid < batch_size) &
             (yy >= 0) & (yy < ny) & (xx >= 0) & (xx < nx))
    gidx = np.where(valid, bid * nynx_pad + yy * nx + xx, sentinel).astype(np.int32)

    order = np.argsort(gidx, kind="stable")
    sorted_idx = gidx[order]

    tile_starts = np.arange(batch_size * num_tiles, dtype=np.int64) * tile_n
    s = np.searchsorted(sorted_idx, tile_starts, side="left")
    e = np.searchsorted(sorted_idx, tile_starts + tile_n, side="left")
    blocks_needed = np.where(e > s, (e - 1) // pk - s // pk + 1, 0).astype(np.int32)
    num_k = int(max(1, int(blocks_needed.max())))    # static grid extent
    start_block = (s // pk).astype(np.int32)          # [B*num_tiles]

    num_real_blocks = -(-P // pk)
    num_pblocks = num_real_blocks + 1   # one sentinel tail block: sb never OOB
    p_pad = num_pblocks * pk

    # ---- device-side packing ------------------------------------------------
    order_d = jnp.asarray(order, dtype=jnp.int32)
    feat_sorted = voxel_features[order_d]
    if matmul_dtype is not None:
        feat_sorted = feat_sorted.astype(matmul_dtype)
    feat_sorted = jnp.concatenate(
        [feat_sorted, jnp.zeros((p_pad - P, C), feat_sorted.dtype)], axis=0)
    idx_sorted = jnp.concatenate(
        [jnp.asarray(sorted_idx, dtype=jnp.int32),
         jnp.full((p_pad - P,), sentinel, jnp.int32)], axis=0)

    # [nb, C, pk]: pre-transposed feature blocks (tiny vs. the canvas).
    feat_t_blocks = jnp.transpose(feat_sorted.reshape(num_pblocks, pk, C),
                                  (0, 2, 1))
    # [nb, pk, 1]: folded indices, sublane-major so the mask compare broadcasts.
    idx_blocks = idx_sorted.reshape(num_pblocks, pk, 1)

    # Both inputs are indexed by voxel-block along dim 0; clamp k so skipped
    # steps re-request the same block (pipeline skips the DMA).
    def in_idx(b, t, k, sb, nblk):
        tid = b * num_tiles + t
        kk = jnp.minimum(k, jnp.maximum(nblk[tid] - 1, 0))
        return (sb[tid] + kk, 0, 0)

    total_steps = int(max(1, int(blocks_needed.sum())))
    cost = pl.CostEstimate(
        flops=2 * C * pk * tile_n * total_steps,
        transcendentals=0,
        bytes_accessed=(batch_size * C * nynx_pad * 4
                        + total_steps * (C * pk + pk) * 4))

    canvas = pl.pallas_call(
        _scatter_kernel,
        out_shape=jax.ShapeDtypeStruct((batch_size, C, nynx_pad), jnp.float32),
        grid_spec=pltpu.PrefetchScalarGridSpec(
            num_scalar_prefetch=2,
            grid=(batch_size, num_tiles, num_k),
            in_specs=[
                pl.BlockSpec((None, pk, 1), in_idx),
                pl.BlockSpec((None, C, pk), in_idx),
            ],
            out_specs=pl.BlockSpec((None, C, tile_n),
                                   lambda b, t, k, sb, nblk: (b, 0, t)),
        ),
        compiler_params=pltpu.CompilerParams(
            dimension_semantics=("parallel", "parallel", "arbitrary")),
        cost_estimate=cost,
    )(jnp.asarray(start_block), jnp.asarray(blocks_needed),
      idx_blocks, feat_t_blocks)

    if nynx_pad != nynx:
        canvas = canvas[:, :, :nynx]
    # [B, C, ny*nx] -> NCHW [B, C, ny, nx] (pure reshape, no transpose).
    return canvas.reshape(batch_size, C, ny, nx)


def _reference_scatter(voxel_features, coords, batch_size, ny, nx):
    """Pure-JAX reference mirroring the PyTorch forward."""
    P, C = voxel_features.shape
    out = []
    for b in range(batch_size):
        mask = coords[:, 0] == b
        idx = coords[:, 2] * nx + coords[:, 3]
        vox = jnp.where(mask[:, None], voxel_features, 0.0)
        idx = jnp.where(mask, idx, ny * nx)  # out-of-range -> dropped
        canvas = jnp.zeros((ny * nx, C), voxel_features.dtype).at[idx].set(
            vox, mode="drop")
        out.append(canvas.T)
    return jnp.stack(out, 0).reshape(batch_size, C, ny, nx)


if __name__ == "__main__":
    key = jax.random.PRNGKey(0)
    batch_size = 2
    C = 64            # num_input_features
    ny, nx = 32, 32   # output_shape[2], output_shape[3]
    P = 64            # number of non-empty pillars

    k_feat, k_perm = jax.random.split(key)
    voxel_features = jax.random.normal(k_feat, (P, C), dtype=jnp.float32)

    # Unique (batch, y, x) pillar coordinates (matches real PointPillars).
    flat = jax.random.permutation(k_perm, batch_size * ny * nx)[:P].astype(jnp.int32)
    b_ids = flat // (ny * nx)
    rem = flat % (ny * nx)
    coords = jnp.stack(
        [b_ids, jnp.zeros(P, jnp.int32), rem // nx, rem % nx], axis=1
    )  # [P, 4] = (batch, z, y, x)

    out = point_pillars_scatter(voxel_features, coords, batch_size, ny, nx,
                                tile_n=512, pk=128)
    out = jax.block_until_ready(out)

    ref = jax.block_until_ready(
        _reference_scatter(voxel_features, coords, batch_size, ny, nx))
    assert out.shape == (batch_size, C, ny, nx)
    np.testing.assert_allclose(np.asarray(out), np.asarray(ref),
                               rtol=1e-5, atol=1e-5)
    print("KERNEL_OK")
</pallas_src>

<mosaic_0001>
module attributes {stable_mosaic.version = 11 : i64} {
  func.func @_scatter_kernel(%arg0: i32, %arg1: i32, %arg2: i32, %arg3: memref<4xi32, #tpu.memory_space<smem>>, %arg4: memref<4xi32, #tpu.memory_space<smem>>, %arg5: memref<1x128x1xi32, #tpu.memory_space<vmem>>, %arg6: memref<1x64x128xf32, #tpu.memory_space<vmem>>, %arg7: memref<1x64x512xf32, #tpu.memory_space<vmem>>) attributes {dimension_semantics = [#tpu.dimension_semantics<parallel>, #tpu.dimension_semantics<parallel>, #tpu.dimension_semantics<arbitrary>], iteration_bounds = array<i64: 2, 2, 1>, scalar_prefetch = 2 : i64, scratch_operands = 0 : i64, tpu.core_type = #tpu.core_type<tc>, window_params = [{transform_indices = @transform_0, window_bounds = array<i64: 1, 128, 1>}, {transform_indices = @transform_1, window_bounds = array<i64: 1, 64, 128>}, {transform_indices = @transform_2, window_bounds = array<i64: 1, 64, 512>}]} {
    %c0_i32 = arith.constant 0 : i32
    %0 = arith.cmpi eq, %arg2, %c0_i32 : i32
    %1 = arith.extui %0 : i1 to i32
    %c0_i32_0 = arith.constant 0 : i32
    %2 = arith.cmpi ne, %1, %c0_i32_0 : i32
    scf.if %2 {
      %cst = arith.constant 0.000000e+00 : f32
      %10 = vector.broadcast %cst : f32 to vector<64x512xf32>
      %c0 = arith.constant 0 : index
      %c0_2 = arith.constant 0 : index
      %c0_3 = arith.constant 0 : index
      %11 = vector.load %arg7[%c0, %c0_2, %c0_3] : memref<1x64x512xf32, #tpu.memory_space<vmem>>, vector<1x64x512xf32>
      %12 = vector.shape_cast %11 : vector<1x64x512xf32> to vector<64x512xf32>
      %13 = vector.shape_cast %10 : vector<64x512xf32> to vector<1x64x512xf32>
      tpu.vector_store %arg7[%c0, %c0_2, %c0_3], %13 {strides = array<i32>} : memref<1x64x512xf32, #tpu.memory_space<vmem>>, vector<1x64x512xf32>,
    } else {
    }
    %c2_i32 = arith.constant 2 : i32
    %3 = arith.muli %arg0, %c2_i32 : i32
    %4 = arith.addi %3, %arg1 : i32
    %5 = arith.index_cast %4 : i32 to index
    %6 = memref.load %arg4[%5] : memref<4xi32, #tpu.memory_space<smem>>
    %7 = arith.cmpi slt, %arg2, %6 : i32
    %8 = arith.extui %7 : i1 to i32
    %c0_i32_1 = arith.constant 0 : i32
    %9 = arith.cmpi ne, %8, %c0_i32_1 : i32
    scf.if %9 {
      %c2_i32_2 = arith.constant 2 : i32
      %10 = arith.muli %arg0, %c2_i32_2 : i32
      %11 = arith.addi %10, %arg1 : i32
      %c512_i32 = arith.constant 512 : i32
      %12 = arith.muli %11, %c512_i32 : i32
      %c0 = arith.constant 0 : index
      %c0_3 = arith.constant 0 : index
      %c0_4 = arith.constant 0 : index
      %13 = vector.load %arg5[%c0, %c0_3, %c0_4] : memref<1x128x1xi32, #tpu.memory_space<vmem>>, vector<1x128x1xi32>
      %14 = vector.shape_cast %13 : vector<1x128x1xi32> to vector<128x1xi32>
      %15 = vector.broadcast %12 : i32 to vector<128x1xi32>
      %16 = arith.subi %14, %15 : vector<128x1xi32>
      %17 = tpu.iota {dimensions = array<i32: 1>} : vector<128x512xi32>
      %18 = vector.broadcast %16 : vector<128x1xi32> to vector<128x512xi32>
      %19 = arith.cmpi eq, %17, %18 : vector<128x512xi32>
      %20 = arith.extui %19 : vector<128x512xi1> to vector<128x512xi32>
      %21 = arith.sitofp %20 : vector<128x512xi32> to vector<128x512xf32>
      %c0_5 = arith.constant 0 : index
      %c0_6 = arith.constant 0 : index
      %c0_7 = arith.constant 0 : index
      %22 = vector.load %arg7[%c0_5, %c0_6, %c0_7] : memref<1x64x512xf32, #tpu.memory_space<vmem>>, vector<1x64x512xf32>
      %23 = vector.shape_cast %22 : vector<1x64x512xf32> to vector<64x512xf32>
      %c0_8 = arith.constant 0 : index
      %c0_9 = arith.constant 0 : index
      %c0_10 = arith.constant 0 : index
      %24 = vector.load %arg6[%c0_8, %c0_9, %c0_10] : memref<1x64x128xf32, #tpu.memory_space<vmem>>, vector<1x64x128xf32>
      %25 = vector.shape_cast %24 : vector<1x64x128xf32> to vector<64x128xf32>
      %cst = arith.constant dense<0.000000e+00> : vector<64x512xf32>
      %26 = tpu.matmul %25, %21, %cst {dimension_numbers = #tpu.dot_dimension_numbers<[1], [0], [0], [1], [0, 0, 1, 1], [], []>} : vector<64x128xf32>, vector<128x512xf32>, vector<64x512xf32> -> vector<64x512xf32>
      %27 = arith.addf %23, %26 : vector<64x512xf32>
      %c0_11 = arith.constant 0 : index
      %c0_12 = arith.constant 0 : index
      %c0_13 = arith.constant 0 : index
      %28 = vector.load %arg7[%c0_11, %c0_12, %c0_13] : memref<1x64x512xf32, #tpu.memory_space<vmem>>, vector<1x64x512xf32>
      %29 = vector.shape_cast %28 : vector<1x64x512xf32> to vector<64x512xf32>
      %30 = vector.shape_cast %27 : vector<64x512xf32> to vector<1x64x512xf32>
      tpu.vector_store %arg7[%c0_11, %c0_12, %c0_13], %30 {strides = array<i32>} : memref<1x64x512xf32, #tpu.memory_space<vmem>>, vector<1x64x512xf32>,
    } else {
    }
    return
  }
  func.func @transform_0(%arg0: i32, %arg1: i32, %arg2: i32, %arg3: memref<4xi32, #tpu.memory_space<smem>>, %arg4: memref<4xi32, #tpu.memory_space<smem>>) -> (i32, i32, i32) {
    %c2_i32 = arith.constant 2 : i32
    %0 = arith.muli %arg0, %c2_i32 : i32
    %1 = arith.addi %0, %arg1 : i32
    %2 = arith.index_cast %1 : i32 to index
    %3 = memref.load %arg4[%2] : memref<4xi32, #tpu.memory_space<smem>>
    %c1_i32 = arith.constant 1 : i32
    %4 = arith.subi %3, %c1_i32 : i32
    %c0_i32 = arith.constant 0 : i32
    %5 = arith.maxsi %4, %c0_i32 : i32
    %6 = arith.minsi %arg2, %5 : i32
    %7 = arith.index_cast %1 : i32 to index
    %8 = memref.load %arg3[%7] : memref<4xi32, #tpu.memory_space<smem>>
    %9 = arith.addi %8, %6 : i32
    %c0_i32_0 = arith.constant 0 : i32
    %c0_i32_1 = arith.constant 0 : i32
    %c0_i32_2 = arith.constant 0 : i32
    return %9, %c0_i32_0, %c0_i32_1 : i32, i32, i32
  }
  func.func @transform_1(%arg0: i32, %arg1: i32, %arg2: i32, %arg3: memref<4xi32, #tpu.memory_space<smem>>, %arg4: memref<4xi32, #tpu.memory_space<smem>>) -> (i32, i32, i32) {
    %c2_i32 = arith.constant 2 : i32
    %0 = arith.muli %arg0, %c2_i32 : i32
    %1 = arith.addi %0, %arg1 : i32
    %2 = arith.index_cast %1 : i32 to index
    %3 = memref.load %arg4[%2] : memref<4xi32, #tpu.memory_space<smem>>
    %c1_i32 = arith.constant 1 : i32
    %4 = arith.subi %3, %c1_i32 : i32
    %c0_i32 = arith.constant 0 : i32
    %5 = arith.maxsi %4, %c0_i32 : i32
    %6 = arith.minsi %arg2, %5 : i32
    %7 = arith.index_cast %1 : i32 to index
    %8 = memref.load %arg3[%7] : memref<4xi32, #tpu.memory_space<smem>>
    %9 = arith.addi %8, %6 : i32
    %c0_i32_0 = arith.constant 0 : i32
    %c0_i32_1 = arith.constant 0 : i32
    %c0_i32_2 = arith.constant 0 : i32
    return %9, %c0_i32_0, %c0_i32_1 : i32, i32, i32
  }
  func.func @transform_2(%arg0: i32, %arg1: i32, %arg2: i32, %arg3: memref<4xi32, #tpu.memory_space<smem>>, %arg4: memref<4xi32, #tpu.memory_space<smem>>) -> (i32, i32, i32) {
    %c0_i32 = arith.constant 0 : i32
    %c0_i32_0 = arith.constant 0 : i32
    return %arg0, %c0_i32, %arg1 : i32, i32, i32
  }
}

</mosaic_0001>

<bundles_post_ra>
// kernel: tpu_custom_call.1
= control target key start
LH: loop header
LB: loop body
LE: loop exit
PB: predicated region body
PF: predicated region fallthrough
CT: control target
= control target key end

     0   :  { %s1428_s21 = smov [#allocation3]   ;;  %s1429_s22 = smov [#allocation4]   ;;  %s1879_s0 = inlined_call_operand.vmem [shape: s32[4], index: 0, kind: input, shape index: {}]   ;;  %s1880_s2 = inlined_call_operand.vmem [shape: s32[2,128,1], index: 2, kind: input, shape index: {}]   ;;  %s1881_s3 = inlined_call_operand.vmem [shape: f32[2,64,128], index: 3, kind: input, shape index: {}]   ;;  %s1882_s4 = inlined_call_operand.hbm [shape: f32[2,64,1024], index: 4, kind: output, shape index: {}]   ;;  %s1883_s1 = inlined_call_operand.vmem [shape: s32[4], index: 1, kind: input, shape index: {}]  }
   0x1   :  { %s10_s17 = sshll.u32 %s1879_s0, 4  ;;  %s15_s20 = sshll.u32 %s1883_s1, 4  ;;  %s11_s17 = int_to_ptr.vmem [resolvable:$true] %s10_s17  ;;  %s16_s20 = int_to_ptr.vmem [resolvable:$true] %s15_s20 }
   0x2   :  { %13 = dma.vmem_to_smem %s11_s17, 16, %s1428_s21, [#allocation2] }
   0x3   :  { %18 = dma.vmem_to_smem %s16_s20, 16, %s1429_s22, [#allocation2] }
   0x4   :  { %1390 = dma.done.wait [#allocation2], 32 }
   0x5   :  { %1391 = vsyncadd [#allocation2], 4294967264 }
   0x6   :  { %21 = sfence }
   0x7   :  { %22 = vsyncpa [#allocation6], 0 }
   0x8   :  { %24 = vsyncpa [#allocation6 + $0x1], 0  ;;  %s1467_s23 = smov 0   ;;  %s1469_s24 = smov 0  }
   0x9   :  { %s1471_s0 = smov 0   ;;  %s1473_s25 = smov 0  }
   0xa   :  { %s1475_s1 = smov 0   ;;  %s1477_s26 = smov 0  }
   0xb   :  { %s1479_s27 = smov 0   ;;  %s1481_s28 = smov 0  }
   0xc LB: > { %s1038_s29 = sadd.s32 4294967295, %s1426_s28   ;;  %s1039_s30 = sadd.s32 4294967294, %s1426_s28   ;;  %s1426_s28 = sphi %s1481_s28, %s30_s28   ;;  %s1422_s27 = sphi %s1479_s27, %s1893_s27   ;;  %s1418_s26 = sphi %s1477_s26, %s1892_s26   ;;  %s1414_s1 = sphi %s1475_s1, %s1891_s1   ;;  %s1410_s25 = sphi %s1473_s25, %s1890_s25   ;;  %s1406_s0 = sphi %s1471_s0, %s1889_s0   ;;  %s1402_s24 = sphi %s1469_s24, %s1888_s24   ;;  %s1398_s23 = sphi %s1467_s23, %s1887_s23  }
   0xd   : > { %s45_s5 = sadd.s32 1, %s1418_s26  ;;  %s49_s6 = sadd.s32 1, %s1422_s27 }
   0xe   : > { %p47_p0 = scmp.ge.s32.totalorder %s45_s5, 2  ;;  %p160_p1 = scmp.ne.s32.totalorder %s1406_s0, %s1402_s24 }
   0xf   : > { %p161_p2 = scmp.eq.s32.totalorder %s1038_s29, 3  ;;  %p166_p5 = scmp.ne.s32.totalorder %s1402_s24, %s1398_s23 }
  0x10   : > { %s1895_s5 = smov (%p47_p0, %s45_s5), 0  ;;  %s1897_s6 = smov (!%p47_p0, %s49_s6), %s1422_s27 }
  0x11   : > { %s146_s7 = ssub.s32 %s1418_s26, %s1895_s5  ;;  %p1518_p3 = por %p161_p2, %p160_p1 }
  0x12   : > { %p51_p4 = scmp.ge.s32.totalorder %s1897_s6, 2  ;;  %p167_p6 = scmp.eq.s32.totalorder %s1039_s30, 3 }
  0x13   : > { %p1054_p7 = scmp.ge.s32.totalorder %s1426_s28, 1  ;;  %p241_p9 = scmp.lt.s32.totalorder %s1426_s28, 5 }
  0x14   : > { %s1899_s6 = smov (%p51_p4, %s1897_s6), 0  ;;  %p1527_p8 = por %p167_p6, %p166_p5 }
  0x15   : > { %s145_s10 = ssub.s32 %s1422_s27, %s1899_s6  ;;  %s150_s11 = sadd.s32 1, %s1406_s0 }
  0x16   : > { %s147_s12 = sor.u32 %s146_s7, %s145_s10  ;;  %p242_p10 = pnand %p1054_p7, %p241_p9 }
  0x17   : > { %p148_p11 = scmp.eq.s32.totalorder %s147_s12, 0  ;;  %s285_s14 = sand.u32 (!%p242_p10), 1, %s1402_s24  }
  0x18   : > { %245 = sbr.rel (%p242_p10) target bundleno = 434 (0x1b2), region = 28  ;;  %s1056_s15 = sshll.u32 (!%p242_p10), %s1414_s1, 1 }
  0x19   : > { %s1536_s13 = scalar_select %p148_p11, %s1406_s0, %s150_s11  }
  0x1a   : > { %s1055_s16 = sshll.u32 (!%p242_p10), %s285_s14, 8  ;;  %s1543_s17 = sadd.s32 (!%p242_p10), %s1410_s25, %s1056_s15 }
  0x1b   : > { %s290_s18 = sld [smem:[#allocation4 + %s1543_s17]] (!%p242_p10)  ;;  %s1546_s19 = scalar_lea.vmem (!%p242_p10), [#allocation5], %s1055_s16 }
  0x1c   : > { %s315_s20 = sld [smem:[#allocation4 + %s1543_s17]] (!%p242_p10) }
  0x1d   : > { %v1430_v0 = vmov 0.0   ;;  %s1554_s21 = sld [smem:[#allocation4 + %s1543_s17]] }
  0x1e   : > { %343 = vst [vmem:[%s1546_s19] sm:$0xff] %v1430_v0  ;;  %s296_s22 = sld [smem:[#allocation3 + %s1543_s17]] }
  0x1f   : > { %344 = vst [vmem:[%s1546_s19 + $0x8] sm:$0xff] %v1430_v0  ;;  %s321_s7 = sld [smem:[#allocation3 + %s1543_s17]] }
  0x20   : > { %345 = vst [vmem:[%s1546_s19 + $0x10] sm:$0xff] %v1430_v0 }
  0x21   : > { %346 = vst [vmem:[%s1546_s19 + $0x18] sm:$0xff] %v1430_v0  ;;  %s1057_s29 = sadd.s32 4294967295, %s290_s18 }
  0x22   : > { %347 = vst [vmem:[%s1546_s19 + $0x20] sm:$0xff] %v1430_v0  ;;  %p292_p12 = scmp.gt.s32.totalorder %s1057_s29, 0  ;;  %s1062_s30 = sadd.s32 4294967295, %s315_s20 }
  0x23   : > { %348 = vst [vmem:[%s1546_s19 + $0x28] sm:$0xff] %v1430_v0  ;;  %p1563_p13 = scmp.gt.s32.totalorder %s1062_s30, 0  ;;  %p1068_p2 = scmp.le.s32.totalorder %s1554_s21, 0 }
  0x24   : > { %349 = vst [vmem:[%s1546_s19 + $0x30] sm:$0xff] %v1430_v0  ;;  %s1901_s29 = smov (!%p292_p12, %s1057_s29), 0  ;;  %s1069_s10 = sshll.u32 (!%p1068_p2), %s1543_s17, 9 }
  0x25   : > { %350 = vst [vmem:[%s1546_s19 + $0x38] sm:$0xff] %v1430_v0  ;;  %s1903_s29 = smov (%p292_p12, %s1901_s29), 0  ;;  %s1905_s30 = smov (!%p1563_p13, %s1062_s30), 0 }
  0x26   : > { %351 = vst [vmem:[%s1546_s19 + $0x40] sm:$0xff] %v1430_v0  ;;  %s297_s11 = sadd.s32 %s296_s22, %s1903_s29  ;;  %s1907_s30 = smov (%p1563_p13, %s1905_s30), 0 }
  0x27   : > { %352 = vst [vmem:[%s1546_s19 + $0x48] sm:$0xff] %v1430_v0  ;;  %p298_p0 = scmp.lt.s32.totalorder %s297_s11, 1  ;;  %s322_s12 = sadd.s32 %s321_s7, %s1907_s30 }
  0x28   : > { %353 = vst [vmem:[%s1546_s19 + $0x50] sm:$0xff] %v1430_v0  ;;  %p323_p1 = scmp.lt.s32.totalorder %s322_s12, 1 }
  0x29   : > { %354 = vst [vmem:[%s1546_s19 + $0x58] sm:$0xff] %v1430_v0  ;;  %s1909_s11 = smov (!%p298_p0, %s297_s11), 1 }
  0x2a   : > { %355 = vst [vmem:[%s1546_s19 + $0x60] sm:$0xff] %v1430_v0  ;;  %s1219_s15 = sshll.u32 %s1909_s11, 7  ;;  %s1911_s12 = smov (!%p323_p1, %s322_s12), 1 }
  0x2b   : > { %356 = vst [vmem:[%s1546_s19 + $0x68] sm:$0xff] %v1430_v0  ;;  %s1583_s20 = scalar_lea.vmem %s1880_s2, %s1219_s15  ;;  %s1223_s22 = sshll.u32 %s1911_s12, 6 }
  0x2c   : > { %357 = vst [vmem:[%s1546_s19 + $0x70] sm:$0xff] %v1430_v0  ;;  %s1592_s7 = scalar_lea.vmem %s1881_s3, %s1223_s22 }
  0x2d   : > { %358 = vst [vmem:[%s1546_s19 + $0x78] sm:$0xff] %v1430_v0 }
  0x2e   : > { %359 = vst [vmem:[%s1546_s19 + $0x80] sm:$0xff] %v1430_v0 }
  0x2f   : > { %360 = vst [vmem:[%s1546_s19 + $0x88] sm:$0xff] %v1430_v0 }
  0x30   : > { %361 = vst [vmem:[%s1546_s19 + $0x90] sm:$0xff] %v1430_v0 }
  0x31   : > { %362 = vst [vmem:[%s1546_s19 + $0x98] sm:$0xff] %v1430_v0 }
  0x32   : > { %363 = vst [vmem:[%s1546_s19 + $0xa0] sm:$0xff] %v1430_v0 }
  0x33   : > { %364 = vst [vmem:[%s1546_s19 + $0xa8] sm:$0xff] %v1430_v0 }
  0x34   : > { %365 = vst [vmem:[%s1546_s19 + $0xb0] sm:$0xff] %v1430_v0 }
  0x35   : > { %366 = vst [vmem:[%s1546_s19 + $0xb8] sm:$0xff] %v1430_v0 }
  0x36   : > { %367 = vst [vmem:[%s1546_s19 + $0xc0] sm:$0xff] %v1430_v0 }
  0x37   : > { %368 = vst [vmem:[%s1546_s19 + $0xc8] sm:$0xff] %v1430_v0 }
  0x38   : > { %369 = vst [vmem:[%s1546_s19 + $0xd0] sm:$0xff] %v1430_v0 }
  0x39   : > { %370 = vst [vmem:[%s1546_s19 + $0xd8] sm:$0xff] %v1430_v0  ;;  %381 = sbr.rel (%p1068_p2) target bundleno = 415 (0x19f), region = 36 }
  0x3a   : > { %371 = vst [vmem:[%s1546_s19 + $0xe0] sm:$0xff] %v1430_v0 }
  0x3b   : > { %372 = vst [vmem:[%s1546_s19 + $0xe8] sm:$0xff] %v1430_v0 }
  0x3c   : > { %373 = vst [vmem:[%s1546_s19 + $0xf0] sm:$0xff] %v1430_v0 }
  0x3d   : > { %374 = vst [vmem:[%s1546_s19 + $0xf8] sm:$0xff] %v1430_v0 }
  0x3e   : > { %v398_v1 = vld [vmem:[%s1583_s20 + $0x78] sm:$0xff]  ;;  %v396_v2 = vld [vmem:[%s1583_s20 + $0x68] sm:$0xff]  ;;  %v1431_v4 = vmov 0   ;;  %v399_v5 = vstv %s1069_s10  ;;  %v397_v9 = vld [vmem:[%s1583_s20 + $0x70] sm:$0xff]  ;;  %v416_v35 = vlaneseq  ;;  %v1432_v43 = vmov 1.0  }
  0x3f   : > { %v394_v3 = vld [vmem:[%s1583_s20 + $0x58] sm:$0xff]  ;;  %1305 = vset.pattern.permute.xlu2 %v1431_v4  ;;  %1304 = vset.pattern.permute.xlu1 %v1431_v4  ;;  %v415_v6 = vsub.s32 %v398_v1, %v399_v5  ;;  %v413_v7 = vsub.s32 %v396_v2, %v399_v5  ;;  %v395_v10 = vld [vmem:[%s1583_s20 + $0x60] sm:$0xff]  ;;  %v393_v11 = vld [vmem:[%s1583_s20 + $0x50] sm:$0xff]  ;;  %v414_v12 = vsub.s32 %v397_v9, %v399_v5 }
  0x40   : > { %1303 = vset.pattern.permute.xlu0 %v1431_v4  ;;  %v411_v8 = vsub.s32 %v394_v3, %v399_v5  ;;  %v412_v13 = vsub.s32 %v395_v10, %v399_v5  ;;  %v410_v14 = vsub.s32 %v393_v11, %v399_v5  ;;  %v392_v15 = vld [vmem:[%s1583_s20 + $0x48] sm:$0xff]  ;;  %v391_v16 = vld [vmem:[%s1583_s20 + $0x40] sm:$0xff]  ;;  %v390_v17 = vld [vmem:[%s1583_s20 + $0x38] sm:$0xff]  ;;  %v1622_v37 = vand.u32 127, %v416_v35 }
  0x41   : > { %467 = vperm.xlu0 %1303, %v415_v6   ;;  %461 = vperm.xlu1 %1304, %v413_v7   ;;  %v409_v18 = vsub.s32 %v392_v15, %v399_v5  ;;  %v408_v19 = vsub.s32 %v391_v16, %v399_v5  ;;  %v407_v20 = vsub.s32 %v390_v17, %v399_v5  ;;  %v389_v21 = vld [vmem:[%s1583_s20 + $0x30] sm:$0xff]  ;;  %v388_v22 = vld [vmem:[%s1583_s20 + $0x28] sm:$0xff]  ;;  %v387_v23 = vld [vmem:[%s1583_s20 + $0x20] sm:$0xff] }
  0x42   : > { %455 = vperm.xlu2 %1305, %v411_v8   ;;  %v406_v24 = vsub.s32 %v389_v21, %v399_v5  ;;  %v405_v25 = vsub.s32 %v388_v22, %v399_v5  ;;  %v404_v26 = vsub.s32 %v387_v23, %v399_v5  ;;  %v386_v27 = vld [vmem:[%s1583_s20 + $0x18] sm:$0xff]  ;;  %v385_v28 = vld [vmem:[%s1583_s20 + $0x10] sm:$0xff]  ;;  %v384_v29 = vld [vmem:[%s1583_s20 + $0x8] sm:$0xff]  ;;  %v1625_v38 = vadd.s32 128, %v1622_v37 }
  0x43   : > { %v403_v30 = vsub.s32 %v386_v27, %v399_v5  ;;  %v402_v31 = vsub.s32 %v385_v28, %v399_v5  ;;  %v401_v32 = vsub.s32 %v384_v29, %v399_v5  ;;  %v383_v33 = vld [vmem:[%s1583_s20] sm:$0xff]  ;;  %v1628_v39 = vadd.s32 256, %v1622_v37  ;;  %v694_v58 = vld [vmem:[%s1592_s7 + $0x8] sm:$0xff]  ;;  %v695_v59 = vld [vmem:[%s1592_s7 + $0x10] sm:$0xff] }
  0x44   : > { %v400_v34 = vsub.s32 %v383_v33, %v399_v5  ;;  %v1631_v40 = vadd.s32 384, %v1622_v37  ;;  %v693_v57 = vld [vmem:[%s1592_s7] sm:$0xff]  ;;  %v696_v60 = vld [vmem:[%s1592_s7 + $0x18] sm:$0xff]  ;;  %v698_v62 = vld [vmem:[%s1592_s7 + $0x28] sm:$0xff] }
  0x45   : > { %v697_v61 = vld [vmem:[%s1592_s7 + $0x20] sm:$0xff]  ;;  %v699_v63 = vld [vmem:[%s1592_s7 + $0x30] sm:$0xff]  ;;  %v700_v0 = vld [vmem:[%s1592_s7 + $0x38] sm:$0xff] }
  0x46   : > { %v661_v1 = vld [vmem:[%s1546_s19] sm:$0xff]  ;;  %v662_v2 = vld [vmem:[%s1546_s19 + $0x8] sm:$0xff]  ;;  %v663_v7 = vld [vmem:[%s1546_s19 + $0x10] sm:$0xff] }
  0x47   : > { %v664_v8 = vld [vmem:[%s1546_s19 + $0x18] sm:$0xff] }
  0x49   : > { %464 = vperm.xlu0 %1303, %v414_v12   ;;  %458 = vperm.xlu1 %1304, %v412_v13   ;;  %v665_v13 = vld [vmem:[%s1546_s19 + $0x20] sm:$0xff] }
  0x4a   : > { %452 = vperm.xlu2 %1305, %v410_v14   ;;  %v666_v14 = vld [vmem:[%s1546_s19 + $0x28] sm:$0xff] }
  0x51   : > { %449 = vperm.xlu0 %1303, %v409_v18   ;;  %446 = vperm.xlu1 %1304, %v408_v19   ;;  %v667_v19 = vld [vmem:[%s1546_s19 + $0x30] sm:$0xff] }
  0x52   : > { %443 = vperm.xlu2 %1305, %v407_v20   ;;  %v668_v20 = vld [vmem:[%s1546_s19 + $0x38] sm:$0xff] }
  0x59   : > { %440 = vperm.xlu0 %1303, %v406_v24   ;;  %437 = vperm.xlu1 %1304, %v405_v25   ;;  %v669_v25 = vld [vmem:[%s1546_s19 + $0x40] sm:$0xff] }
  0x5a   : > { %434 = vperm.xlu2 %1305, %v404_v26   ;;  %v670_v26 = vld [vmem:[%s1546_s19 + $0x48] sm:$0xff] }
  0x61   : > { %431 = vperm.xlu0 %1303, %v403_v30   ;;  %428 = vperm.xlu1 %1304, %v402_v31   ;;  %v671_v31 = vld [vmem:[%s1546_s19 + $0x50] sm:$0xff] }
  0x62   : > { %425 = vperm.xlu2 %1305, %v401_v32   ;;  %v672_v32 = vld [vmem:[%s1546_s19 + $0x58] sm:$0xff] }
  0x69   : > { %422 = vperm.xlu0 %1303, %v400_v34  }
  0x9c   : > { %v456_v36 = vpop.permute.xlu2 %455 }
  0xa4   : > { %v453_v44 = vpop.permute.xlu2 %452 }
  0xac   : > { %v444_v47 = vpop.permute.xlu2 %443 }
  0xb3   : > { %v468_v41 = vpop.permute.xlu0 %467  ;;  %v462_v42 = vpop.permute.xlu1 %461 }
  0xb4   : > { %vm529_vm0 = vcmp.eq.s32.totalorder %v1622_v37, %v468_v41  ;;  %vm530_vm1 = vcmp.eq.s32.totalorder %v1625_v38, %v468_v41  ;;  %vm531_vm2 = vcmp.eq.s32.totalorder %v1628_v39, %v468_v41  ;;  %vm532_vm3 = vcmp.eq.s32.totalorder %v1631_v40, %v468_v41  ;;  %v435_v50 = vpop.permute.xlu2 %434 }
  0xb5   : > { %1134 = vmatpush.msk.msra.mxu0 %vm529_vm0, %v1432_v43  ;;  %1150 = vmatpush.msk.msra.mxu1 %vm530_vm1, %v1432_v43  ;;  %vm521_vm8 = vcmp.eq.s32.totalorder %v1622_v37, %v462_v42  ;;  %vm522_vm9 = vcmp.eq.s32.totalorder %v1625_v38, %v462_v42  ;;  %vm523_vm10 = vcmp.eq.s32.totalorder %v1628_v39, %v462_v42 }
  0xb6   : > { %1166 = vmatpush.msk.msra.mxu2 %vm531_vm2, %v1432_v43  ;;  %1182 = vmatpush.msk.msra.mxu3 %vm532_vm3, %v1432_v43  ;;  %vm524_vm11 = vcmp.eq.s32.totalorder %v1631_v40, %v462_v42  ;;  %vm513_vm0 = vcmp.eq.s32.totalorder %v1622_v37, %v456_v36  ;;  %vm514_vm1 = vcmp.eq.s32.totalorder %v1625_v38, %v456_v36 }
  0xb7   : > { %vm515_vm2 = vcmp.eq.s32.totalorder %v1628_v39, %v456_v36  ;;  %vm516_vm3 = vcmp.eq.s32.totalorder %v1631_v40, %v456_v36 }
  0xbb   : > { %v465_v45 = vpop.permute.xlu0 %464  ;;  %v459_v46 = vpop.permute.xlu1 %458 }
  0xbc   : > { %vm525_vm4 = vcmp.eq.s32.totalorder %v1622_v37, %v465_v45  ;;  %vm526_vm5 = vcmp.eq.s32.totalorder %v1625_v38, %v465_v45  ;;  %vm527_vm6 = vcmp.eq.s32.totalorder %v1628_v39, %v465_v45  ;;  %vm528_vm7 = vcmp.eq.s32.totalorder %v1631_v40, %v465_v45  ;;  %v426_v55 = vpop.permute.xlu2 %425 }
  0xbd   : > { %1135 = vmatpush.msk.msra.mxu0 %vm525_vm4, %v1432_v43  ;;  %1151 = vmatpush.msk.msra.mxu1 %vm526_vm5, %v1432_v43  ;;  %vm517_vm12 = vcmp.eq.s32.totalorder %v1622_v37, %v459_v46  ;;  %vm518_vm13 = vcmp.eq.s32.totalorder %v1625_v38, %v459_v46  ;;  %vm519_vm14 = vcmp.eq.s32.totalorder %v1628_v39, %v459_v46 }
  0xbe   : > { %1167 = vmatpush.msk.msra.mxu2 %vm527_vm6, %v1432_v43  ;;  %1183 = vmatpush.msk.msra.mxu3 %vm528_vm7, %v1432_v43  ;;  %vm520_vm15 = vcmp.eq.s32.totalorder %v1631_v40, %v459_v46  ;;  %vm509_vm4 = vcmp.eq.s32.totalorder %v1622_v37, %v453_v44  ;;  %vm510_vm5 = vcmp.eq.s32.totalorder %v1625_v38, %v453_v44 }
  0xbf   : > { %1136 = vmatpush.msk.msra.mxu0 %vm521_vm8, %v1432_v43  ;;  %1152 = vmatpush.msk.msra.mxu1 %vm522_vm9, %v1432_v43  ;;  %vm511_vm6 = vcmp.eq.s32.totalorder %v1628_v39, %v453_v44  ;;  %vm512_vm7 = vcmp.eq.s32.totalorder %v1631_v40, %v453_v44  ;;  %v676_v44 = vld [vmem:[%s1546_s19 + $0x78] sm:$0xff] }
  0xc0   : > { %1168 = vmatpush.msk.msra.mxu2 %vm523_vm10, %v1432_v43  ;;  %1184 = vmatpush.msk.msra.mxu3 %vm524_vm11, %v1432_v43 }
  0xc1   : > { %1137 = vmatpush.msk.msra.mxu0 %vm517_vm12, %v1432_v43  ;;  %1153 = vmatpush.msk.msra.mxu1 %vm518_vm13, %v1432_v43 }
  0xc2   : > { %1169 = vmatpush.msk.msra.mxu2 %vm519_vm14, %v1432_v43  ;;  %1185 = vmatpush.msk.msra.mxu3 %vm520_vm15, %v1432_v43 }
  0xc3   : > { %1138 = vmatpush.msk.msra.mxu0 %vm513_vm0, %v1432_v43  ;;  %1154 = vmatpush.msk.msra.mxu1 %vm514_vm1, %v1432_v43  ;;  %v450_v48 = vpop.permute.xlu0 %449  ;;  %v447_v49 = vpop.permute.xlu1 %446  ;;  %vm497_vm0 = vcmp.eq.s32.totalorder %v1622_v37, %v444_v47  ;;  %vm498_vm1 = vcmp.eq.s32.totalorder %v1625_v38, %v444_v47 }
  0xc4   : > { %1170 = vmatpush.msk.msra.mxu2 %vm515_vm2, %v1432_v43  ;;  %1186 = vmatpush.msk.msra.mxu3 %vm516_vm3, %v1432_v43  ;;  %vm505_vm8 = vcmp.eq.s32.totalorder %v1622_v37, %v450_v48  ;;  %vm506_vm9 = vcmp.eq.s32.totalorder %v1625_v38, %v450_v48  ;;  %vm507_vm10 = vcmp.eq.s32.totalorder %v1628_v39, %v450_v48 }
  0xc5   : > { %1139 = vmatpush.msk.msra.mxu0 %vm509_vm4, %v1432_v43  ;;  %1155 = vmatpush.msk.msra.mxu1 %vm510_vm5, %v1432_v43  ;;  %vm508_vm11 = vcmp.eq.s32.totalorder %v1631_v40, %v450_v48  ;;  %vm501_vm12 = vcmp.eq.s32.totalorder %v1622_v37, %v447_v49  ;;  %vm502_vm13 = vcmp.eq.s32.totalorder %v1625_v38, %v447_v49 }
  0xc6   : > { %1171 = vmatpush.msk.msra.mxu2 %vm511_vm6, %v1432_v43  ;;  %1187 = vmatpush.msk.msra.mxu3 %vm512_vm7, %v1432_v43  ;;  %vm503_vm14 = vcmp.eq.s32.totalorder %v1628_v39, %v447_v49  ;;  %vm504_vm15 = vcmp.eq.s32.totalorder %v1631_v40, %v447_v49  ;;  %vm499_vm2 = vcmp.eq.s32.totalorder %v1628_v39, %v444_v47  ;;  %v677_v49 = vld [vmem:[%s1546_s19 + $0x80] sm:$0xff] }
  0xc7   : > { %1140 = vmatpush.msk.msra.mxu0 %vm505_vm8, %v1432_v43  ;;  %1156 = vmatpush.msk.msra.mxu1 %vm506_vm9, %v1432_v43  ;;  %vm500_vm3 = vcmp.eq.s32.totalorder %v1631_v40, %v444_v47 }
  0xc8   : > { %1172 = vmatpush.msk.msra.mxu2 %vm507_vm10, %v1432_v43  ;;  %1188 = vmatpush.msk.msra.mxu3 %vm508_vm11, %v1432_v43 }
  0xc9   : > { %1141 = vmatpush.msk.msra.mxu0 %vm501_vm12, %v1432_v43  ;;  %1157 = vmatpush.msk.msra.mxu1 %vm502_vm13, %v1432_v43  ;;  %vm485_vm12 = vcmp.eq.s32.totalorder %v1622_v37, %v435_v50  ;;  %vm486_vm13 = vcmp.eq.s32.totalorder %v1625_v38, %v435_v50 }
  0xca   : > { %1173 = vmatpush.msk.msra.mxu2 %vm503_vm14, %v1432_v43  ;;  %1189 = vmatpush.msk.msra.mxu3 %vm504_vm15, %v1432_v43  ;;  %vm487_vm14 = vcmp.eq.s32.totalorder %v1628_v39, %v435_v50  ;;  %vm488_vm15 = vcmp.eq.s32.totalorder %v1631_v40, %v435_v50  ;;  %v678_v50 = vld [vmem:[%s1546_s19 + $0x88] sm:$0xff] }
  0xcb   : > { %1142 = vmatpush.msk.msra.mxu0 %vm497_vm0, %v1432_v43  ;;  %1158 = vmatpush.msk.msra.mxu1 %vm498_vm1, %v1432_v43  ;;  %v441_v51 = vpop.permute.xlu0 %440  ;;  %v438_v52 = vpop.permute.xlu1 %437 }
  0xcc   : > { %1174 = vmatpush.msk.msra.mxu2 %vm499_vm2, %v1432_v43  ;;  %1190 = vmatpush.msk.msra.mxu3 %vm500_vm3, %v1432_v43  ;;  %vm493_vm4 = vcmp.eq.s32.totalorder %v1622_v37, %v441_v51  ;;  %vm494_vm5 = vcmp.eq.s32.totalorder %v1625_v38, %v441_v51  ;;  %vm495_vm6 = vcmp.eq.s32.totalorder %v1628_v39, %v441_v51 }
  0xcd   : > { %1143 = vmatpush.msk.msra.mxu0 %vm493_vm4, %v1432_v43  ;;  %1159 = vmatpush.msk.msra.mxu1 %vm494_vm5, %v1432_v43  ;;  %vm496_vm7 = vcmp.eq.s32.totalorder %v1631_v40, %v441_v51  ;;  %vm489_vm8 = vcmp.eq.s32.totalorder %v1622_v37, %v438_v52  ;;  %vm490_vm9 = vcmp.eq.s32.totalorder %v1625_v38, %v438_v52 }
  0xce   : > { %1175 = vmatpush.msk.msra.mxu2 %vm495_vm6, %v1432_v43  ;;  %1191 = vmatpush.msk.msra.mxu3 %vm496_vm7, %v1432_v43  ;;  %vm491_vm10 = vcmp.eq.s32.totalorder %v1628_v39, %v438_v52  ;;  %vm492_vm11 = vcmp.eq.s32.totalorder %v1631_v40, %v438_v52 }
  0xcf   : > { %1144 = vmatpush.msk.msra.mxu0 %vm489_vm8, %v1432_v43  ;;  %1160 = vmatpush.msk.msra.mxu1 %vm490_vm9, %v1432_v43  ;;  %vm473_vm8 = vcmp.eq.s32.totalorder %v1622_v37, %v426_v55  ;;  %vm474_vm9 = vcmp.eq.s32.totalorder %v1625_v38, %v426_v55 }
  0xd0   : > { %1176 = vmatpush.msk.msra.mxu2 %vm491_vm10, %v1432_v43  ;;  %1192 = vmatpush.msk.msra.mxu3 %vm492_vm11, %v1432_v43  ;;  %vm475_vm10 = vcmp.eq.s32.totalorder %v1628_v39, %v426_v55  ;;  %vm476_vm11 = vcmp.eq.s32.totalorder %v1631_v40, %v426_v55  ;;  %v679_v55 = vld [vmem:[%s1546_s19 + $0x90] sm:$0xff] }
  0xd1   : > { %1145 = vmatpush.msk.msra.mxu0 %vm485_vm12, %v1432_v43  ;;  %1161 = vmatpush.msk.msra.mxu1 %vm486_vm13, %v1432_v43 }
  0xd2   : > { %1177 = vmatpush.msk.msra.mxu2 %vm487_vm14, %v1432_v43  ;;  %1193 = vmatpush.msk.msra.mxu3 %vm488_vm15, %v1432_v43 }
  0xd3   : > { %v432_v53 = vpop.permute.xlu0 %431  ;;  %v429_v54 = vpop.permute.xlu1 %428 }
  0xd4   : > { %vm481_vm0 = vcmp.eq.s32.totalorder %v1622_v37, %v432_v53  ;;  %vm482_vm1 = vcmp.eq.s32.totalorder %v1625_v38, %v432_v53  ;;  %vm483_vm2 = vcmp.eq.s32.totalorder %v1628_v39, %v432_v53  ;;  %vm484_vm3 = vcmp.eq.s32.totalorder %v1631_v40, %v432_v53 }
  0xd5   : > { %1146 = vmatpush.msk.msra.mxu0 %vm481_vm0, %v1432_v43  ;;  %1162 = vmatpush.msk.msra.mxu1 %vm482_vm1, %v1432_v43  ;;  %vm477_vm4 = vcmp.eq.s32.totalorder %v1622_v37, %v429_v54  ;;  %vm478_vm5 = vcmp.eq.s32.totalorder %v1625_v38, %v429_v54  ;;  %vm479_vm6 = vcmp.eq.s32.totalorder %v1628_v39, %v429_v54 }
  0xd6   : > { %1178 = vmatpush.msk.msra.mxu2 %vm483_vm2, %v1432_v43  ;;  %1194 = vmatpush.msk.msra.mxu3 %vm484_vm3, %v1432_v43  ;;  %vm480_vm7 = vcmp.eq.s32.totalorder %v1631_v40, %v429_v54 }
  0xd7   : > { %1147 = vmatpush.msk.msra.mxu0 %vm477_vm4, %v1432_v43  ;;  %1163 = vmatpush.msk.msra.mxu1 %vm478_vm5, %v1432_v43 }
  0xd8   : > { %1179 = vmatpush.msk.msra.mxu2 %vm479_vm6, %v1432_v43  ;;  %1195 = vmatpush.msk.msra.mxu3 %vm480_vm7, %v1432_v43 }
  0xd9   : > { %1148 = vmatpush.msk.msra.mxu0 %vm473_vm8, %v1432_v43  ;;  %1164 = vmatpush.msk.msra.mxu1 %vm474_vm9, %v1432_v43 }
  0xda   : > { %1180 = vmatpush.msk.msra.mxu2 %vm475_vm10, %v1432_v43  ;;  %1196 = vmatpush.msk.msra.mxu3 %vm476_vm11, %v1432_v43 }
  0xdb   : > { %v423_v56 = vpop.permute.xlu0 %422 }
  0xdc   : > { %vm469_vm12 = vcmp.eq.s32.totalorder %v1622_v37, %v423_v56  ;;  %vm470_vm13 = vcmp.eq.s32.totalorder %v1625_v38, %v423_v56  ;;  %vm471_vm14 = vcmp.eq.s32.totalorder %v1628_v39, %v423_v56  ;;  %vm472_vm15 = vcmp.eq.s32.totalorder %v1631_v40, %v423_v56  ;;  %v673_v37 = vld [vmem:[%s1546_s19 + $0x60] sm:$0xff]  ;;  %v674_v38 = vld [vmem:[%s1546_s19 + $0x68] sm:$0xff]  ;;  %v680_v56 = vld [vmem:[%s1546_s19 + $0x98] sm:$0xff] }
  0xdd   : > { %1149 = vmatpush.msk.msra.mxu0 %vm469_vm12, %v1432_v43  ;;  %1165 = vmatpush.msk.msra.mxu1 %vm470_vm13, %v1432_v43 }
  0xde   : > { %1181 = vmatpush.msk.msra.mxu2 %vm471_vm14, %v1432_v43  ;;  %1197 = vmatpush.msk.msra.mxu3 %vm472_vm15, %v1432_v43  ;;  %v675_v43 = vld [vmem:[%s1546_s19 + $0x70] sm:$0xff] }
  0xdf   : > { %799 = vmatmul.f32.vlgmr.msra.gmra.mxu2 %v693_v57  ;;  %840 = vmatmul.f32.vlgmr.msra.gmra.mxu3 %v693_v57 }
  0xe0   : > { %717 = vmatmul.f32.vlgmr.msra.gmra.mxu0 %v693_v57  ;;  %758 = vmatmul.f32.vlgmr.msra.gmra.mxu1 %v693_v57 }
  0xe7   : > { %802 = vmatmul.f32.gmra.mxu2 %v694_v58  ;;  %843 = vmatmul.f32.gmra.mxu3 %v694_v58 }
  0xe8   : > { %720 = vmatmul.f32.gmra.mxu0 %v694_v58  ;;  %761 = vmatmul.f32.gmra.mxu1 %v694_v58 }
  0xef   : > { %805 = vmatmul.f32.gmra.mxu2 %v695_v59  ;;  %846 = vmatmul.f32.gmra.mxu3 %v695_v59 }
  0xf0   : > { %723 = vmatmul.f32.gmra.mxu0 %v695_v59  ;;  %764 = vmatmul.f32.gmra.mxu1 %v695_v59 }
  0xf7   : > { %808 = vmatmul.f32.gmra.mxu2 %v696_v60  ;;  %849 = vmatmul.f32.gmra.mxu3 %v696_v60 }
  0xf8   : > { %726 = vmatmul.f32.gmra.mxu0 %v696_v60  ;;  %767 = vmatmul.f32.gmra.mxu1 %v696_v60 }
  0xff   : > { %811 = vmatmul.f32.gmra.mxu2 %v697_v61  ;;  %852 = vmatmul.f32.gmra.mxu3 %v697_v61 }
 0x100   : > { %729 = vmatmul.f32.gmra.mxu0 %v697_v61  ;;  %770 = vmatmul.f32.gmra.mxu1 %v697_v61  ;;  %v681_v61 = vld [vmem:[%s1546_s19 + $0xa0] sm:$0xff] }
 0x107   : > { %814 = vmatmul.f32.gmra.mxu2 %v698_v62  ;;  %855 = vmatmul.f32.gmra.mxu3 %v698_v62 }
 0x108   : > { %732 = vmatmul.f32.gmra.mxu0 %v698_v62  ;;  %773 = vmatmul.f32.gmra.mxu1 %v698_v62  ;;  %v682_v62 = vld [vmem:[%s1546_s19 + $0xa8] sm:$0xff] }
 0x10f   : > { %817 = vmatmul.f32.gmra.mxu2 %v699_v63  ;;  %858 = vmatmul.f32.gmra.mxu3 %v699_v63 }
 0x110   : > { %735 = vmatmul.f32.gmra.mxu0 %v699_v63  ;;  %776 = vmatmul.f32.gmra.mxu1 %v699_v63 }
 0x117   : > { %820 = vmatmul.f32.gmra.mxu2 %v700_v0  ;;  %861 = vmatmul.f32.gmra.mxu3 %v700_v0 }
 0x118   : > { %738 = vmatmul.f32.gmra.mxu0 %v700_v0  ;;  %779 = vmatmul.f32.gmra.mxu1 %v700_v0 }
 0x15d   : > { %v718_v3 = vpop.f32.mrf.mxu0  ;;  %v759_v4 = vpop.f32.mrf.mxu1 }
 0x15e   : > { %v865_v5 = vadd.f32 %v718_v3, %v661_v1  ;;  %v866_v6 = vadd.f32 %v759_v4, %v662_v2  ;;  %v683_v3 = vld [vmem:[%s1546_s19 + $0xb0] sm:$0xff]  ;;  %v684_v4 = vld [vmem:[%s1546_s19 + $0xb8] sm:$0xff] }
 0x160   : > { %897 = vst [vmem:[%s1546_s19] sm:$0xff] %v865_v5 }
 0x161   : > { %898 = vst [vmem:[%s1546_s19 + $0x8] sm:$0xff] %v866_v6 }
 0x162   : > { %v800_v9 = vpop.f32.mrf.mxu2  ;;  %v841_v10 = vpop.f32.mrf.mxu3 }
 0x163   : > { %v867_v11 = vadd.f32 %v800_v9, %v663_v7  ;;  %v868_v12 = vadd.f32 %v841_v10, %v664_v8  ;;  %v685_v9 = vld [vmem:[%s1546_s19 + $0xc0] sm:$0xff]  ;;  %v686_v10 = vld [vmem:[%s1546_s19 + $0xc8] sm:$0xff] }
 0x165   : > { %899 = vst [vmem:[%s1546_s19 + $0x10] sm:$0xff] %v867_v11  ;;  %v721_v15 = vpop.f32.mrf.mxu0  ;;  %v762_v16 = vpop.f32.mrf.mxu1 }
 0x166   : > { %900 = vst [vmem:[%s1546_s19 + $0x18] sm:$0xff] %v868_v12  ;;  %v869_v17 = vadd.f32 %v721_v15, %v665_v13  ;;  %v870_v18 = vadd.f32 %v762_v16, %v666_v14  ;;  %v687_v15 = vld [vmem:[%s1546_s19 + $0xd0] sm:$0xff]  ;;  %v688_v16 = vld [vmem:[%s1546_s19 + $0xd8] sm:$0xff] }
 0x168   : > { %901 = vst [vmem:[%s1546_s19 + $0x20] sm:$0xff] %v869_v17 }
 0x169   : > { %902 = vst [vmem:[%s1546_s19 + $0x28] sm:$0xff] %v870_v18 }
 0x16a   : > { %v803_v21 = vpop.f32.mrf.mxu2  ;;  %v844_v22 = vpop.f32.mrf.mxu3 }
 0x16b   : > { %v871_v23 = vadd.f32 %v803_v21, %v667_v19  ;;  %v872_v24 = vadd.f32 %v844_v22, %v668_v20  ;;  %v689_v21 = vld [vmem:[%s1546_s19 + $0xe0] sm:$0xff]  ;;  %v690_v22 = vld [vmem:[%s1546_s19 + $0xe8] sm:$0xff] }
 0x16d   : > { %903 = vst [vmem:[%s1546_s19 + $0x30] sm:$0xff] %v871_v23  ;;  %v724_v27 = vpop.f32.mrf.mxu0  ;;  %v765_v28 = vpop.f32.mrf.mxu1 }
 0x16e   : > { %904 = vst [vmem:[%s1546_s19 + $0x38] sm:$0xff] %v872_v24  ;;  %v873_v29 = vadd.f32 %v724_v27, %v669_v25  ;;  %v874_v30 = vadd.f32 %v765_v28, %v670_v26  ;;  %v691_v27 = vld [vmem:[%s1546_s19 + $0xf0] sm:$0xff]  ;;  %v692_v28 = vld [vmem:[%s1546_s19 + $0xf8] sm:$0xff] }
 0x170   : > { %905 = vst [vmem:[%s1546_s19 + $0x40] sm:$0xff] %v873_v29 }
 0x171   : > { %906 = vst [vmem:[%s1546_s19 + $0x48] sm:$0xff] %v874_v30 }
 0x172   : > { %v806_v33 = vpop.f32.mrf.mxu2  ;;  %v847_v34 = vpop.f32.mrf.mxu3 }
 0x173   : > { %v875_v35 = vadd.f32 %v806_v33, %v671_v31  ;;  %v876_v36 = vadd.f32 %v847_v34, %v672_v32 }
 0x175   : > { %907 = vst [vmem:[%s1546_s19 + $0x50] sm:$0xff] %v875_v35  ;;  %v727_v39 = vpop.f32.mrf.mxu0  ;;  %v768_v40 = vpop.f32.mrf.mxu1 }
 0x176   : > { %908 = vst [vmem:[%s1546_s19 + $0x58] sm:$0xff] %v876_v36  ;;  %v877_v41 = vadd.f32 %v727_v39, %v673_v37  ;;  %v878_v42 = vadd.f32 %v768_v40, %v674_v38 }
 0x178   : > { %909 = vst [vmem:[%s1546_s19 + $0x60] sm:$0xff] %v877_v41 }
 0x179   : > { %910 = vst [vmem:[%s1546_s19 + $0x68] sm:$0xff] %v878_v42 }
 0x17a   : > { %v809_v45 = vpop.f32.mrf.mxu2  ;;  %v850_v46 = vpop.f32.mrf.mxu3 }
 0x17b   : > { %v879_v47 = vadd.f32 %v809_v45, %v675_v43  ;;  %v880_v48 = vadd.f32 %v850_v46, %v676_v44 }
 0x17d   : > { %911 = vst [vmem:[%s1546_s19 + $0x70] sm:$0xff] %v879_v47  ;;  %v730_v51 = vpop.f32.mrf.mxu0  ;;  %v771_v52 = vpop.f32.mrf.mxu1 }
 0x17e   : > { %912 = vst [vmem:[%s1546_s19 + $0x78] sm:$0xff] %v880_v48  ;;  %v881_v53 = vadd.f32 %v730_v51, %v677_v49  ;;  %v882_v54 = vadd.f32 %v771_v52, %v678_v50 }
 0x180   : > { %913 = vst [vmem:[%s1546_s19 + $0x80] sm:$0xff] %v881_v53 }
 0x181   : > { %914 = vst [vmem:[%s1546_s19 + $0x88] sm:$0xff] %v882_v54 }
 0x182   : > { %v812_v57 = vpop.f32.mrf.mxu2  ;;  %v853_v58 = vpop.f32.mrf.mxu3 }
 0x183   : > { %v883_v59 = vadd.f32 %v812_v57, %v679_v55  ;;  %v884_v60 = vadd.f32 %v853_v58, %v680_v56 }
 0x185   : > { %915 = vst [vmem:[%s1546_s19 + $0x90] sm:$0xff] %v883_v59  ;;  %v733_v63 = vpop.f32.mrf.mxu0  ;;  %v774_v0 = vpop.f32.mrf.mxu1 }
 0x186   : > { %916 = vst [vmem:[%s1546_s19 + $0x98] sm:$0xff] %v884_v60  ;;  %v885_v1 = vadd.f32 %v733_v63, %v681_v61  ;;  %v886_v2 = vadd.f32 %v774_v0, %v682_v62 }
 0x188   : > { %917 = vst [vmem:[%s1546_s19 + $0xa0] sm:$0xff] %v885_v1 }
 0x189   : > { %918 = vst [vmem:[%s1546_s19 + $0xa8] sm:$0xff] %v886_v2 }
 0x18a   : > { %v815_v5 = vpop.f32.mrf.mxu2  ;;  %v856_v6 = vpop.f32.mrf.mxu3 }
 0x18b   : > { %v887_v7 = vadd.f32 %v815_v5, %v683_v3  ;;  %v888_v8 = vadd.f32 %v856_v6, %v684_v4 }
 0x18d   : > { %919 = vst [vmem:[%s1546_s19 + $0xb0] sm:$0xff] %v887_v7  ;;  %v736_v11 = vpop.f32.mrf.mxu0  ;;  %v777_v12 = vpop.f32.mrf.mxu1 }
 0x18e   : > { %920 = vst [vmem:[%s1546_s19 + $0xb8] sm:$0xff] %v888_v8  ;;  %v889_v13 = vadd.f32 %v736_v11, %v685_v9  ;;  %v890_v14 = vadd.f32 %v777_v12, %v686_v10 }
 0x190   : > { %921 = vst [vmem:[%s1546_s19 + $0xc0] sm:$0xff] %v889_v13 }
 0x191   : > { %922 = vst [vmem:[%s1546_s19 + $0xc8] sm:$0xff] %v890_v14 }
 0x192   : > { %v818_v17 = vpop.f32.mrf.mxu2  ;;  %v859_v18 = vpop.f32.mrf.mxu3 }
 0x193   : > { %v891_v19 = vadd.f32 %v818_v17, %v687_v15  ;;  %v892_v20 = vadd.f32 %v859_v18, %v688_v16 }
 0x195   : > { %923 = vst [vmem:[%s1546_s19 + $0xd0] sm:$0xff] %v891_v19  ;;  %v739_v23 = vpop.f32.mrf.mxu0  ;;  %v780_v24 = vpop.f32.mrf.mxu1 }
 0x196   : > { %924 = vst [vmem:[%s1546_s19 + $0xd8] sm:$0xff] %v892_v20  ;;  %v893_v25 = vadd.f32 %v739_v23, %v689_v21  ;;  %v894_v26 = vadd.f32 %v780_v24, %v690_v22 }
 0x198   : > { %925 = vst [vmem:[%s1546_s19 + $0xe0] sm:$0xff] %v893_v25 }
 0x199   : > { %926 = vst [vmem:[%s1546_s19 + $0xe8] sm:$0xff] %v894_v26 }
 0x19a   : > { %v821_v29 = vpop.f32.mrf.mxu2  ;;  %v862_v30 = vpop.f32.mrf.mxu3 }
 0x19b   : > { %v895_v31 = vadd.f32 %v821_v29, %v691_v27  ;;  %v896_v32 = vadd.f32 %v862_v30, %v692_v28 }
 0x19d   : > { %927 = vst [vmem:[%s1546_s19 + $0xf0] sm:$0xff] %v895_v31 }
 0x19e   : > { %928 = vst [vmem:[%s1546_s19 + $0xf8] sm:$0xff] %v896_v32 }
 0x19f PF: > { %s1199_s17 = sshll.u32 %s1410_s25, 2  ;;  %s1200_s21 = sshll.u32 %s1414_s1, 6 }
 0x1a0   : > { %s944_s11 = sshll.u32 %s1546_s19, 4  ;;  %s941_s12 = sadd.s32 %s1200_s21, %s1199_s17  ;;  %s945_s11 = int_to_ptr.vmem [resolvable:$true] %s944_s11 }
 0x1a1   : > { %s1201_s15 = sshll.u32 %s941_s12, 3  ;;  %s930_s29 = scalar_lea.sflag [#allocation6], %s285_s14 }
 0x1a2   : > { %s943_s20 = scalar_lea.hbm %s1882_s4, %s1201_s15  ;;  %s1350_s19 = scalar_lea.hbm %s1882_s4, 1024 }
 0x1a3   : > { %s946_s22 = sshll.u32 %s943_s20, 4  ;;  %s947_s22 = int_to_ptr.hbm [resolvable:$true] %s946_s22 }
 0x1a4   : > { %s1344_s30 = sshra.s32 %s947_s22, 4  ;;  %s1345_s30 = int_to_ptr.hbm [resolvable:$true] %s1344_s30 }
 0x1a5   : > { %s1346_s7 = scalar_lea.hbm %s1345_s30, 256  ;;  %p1351_p7 = scmp.lt.s32.totalorder %s1345_s30, %s1882_s4 }
 0x1a6   : > { %p1347_p4 = scmp.ne.s32.totalorder %s1345_s30, %s1346_s7  ;;  %p1352_p9 = scmp.lt.s32.totalorder %s1350_s19, %s1346_s7 }
 0x1a8   : > { %p1348_p5 = pnand %p1347_p4, %p1518_p3  ;;  %p1353_p10 = por %p1352_p9, %p1351_p7 }
 0x1aa   : > { %p1349_p6 = pneg %p1348_p5 }
 0x1ac   : > { %p1354_p11 = pnand %p1353_p10, %p1349_p6 }
 0x1ae   : > { %1357 = shalt.err (!%p1354_p11)
}
 0x1af   : > { %s1433_s14 = smov 512   ;;  %s1434_s21 = smov 1024  }
 0x1b0   : > { %s1435_s12 = smov 32  }
 0x1b1   : > { %1224 = dma.vmem_to_hbm [thread:$0]  (%p1518_p3), %s945_s11, 4096, %s947_s22, %s930_s29, %s1433_s14, %s1434_s21, %s1435_s12  }
 0x1b2 PF: > { %p1230_p12 = scmp.ge.s32.totalorder %s1426_s28, 2  ;;  %s961_s15 = sand.u32 1, %s1398_s23  }
 0x1b3   : > { %s962_s16 = scalar_lea.sflag [#allocation6], %s961_s15 }
 0x1b4   : > { %p1227_p13 = pnand %p1230_p12, %p1527_p8 }
 0x1b6   : > { %p1228_p0 = pneg %p1227_p13 }
 0x1b8   : > { %1393 = dma.done.wait (%p1228_p0), %s962_s16, 4096  }
 0x1b9   : > { %1395 = vsyncadd (%p1228_p0), %s962_s16, 4294963200  ;;  %s30_s28 = sadd.s32 1, %s1426_s28   ;;  %s1887_s23 = smov %s1402_s24 }
 0x1ba   : > { %p27_p1 = scmp.ge.s32.totalorder %s30_s28, 6   ;;  %s1888_s24 = smov %s1406_s0 }
 0x1bb   : > { %s1889_s0 = smov %s1536_s13  ;;  %s1890_s25 = smov %s1418_s26 }
 0x1bc   : > { %s1891_s1 = smov %s1422_s27  ;;  %s1892_s26 = smov %s1895_s5 }
 0x1bd   : > { %s1893_s27 = smov %s1899_s6  ;;  %29 = sbr.rel (!%p27_p1) target bundleno = 12 (0xc), region = 74 }
 0x1c2   :  { %968 = vsyncpa [#allocation6], 1 }
 0x1c3   :  { %970 = vsyncpa [#allocation6 + $0x1], 1 }

</bundles_post_ra>
